<compile_context>
chip_gen: v7x
topology: tpu7x:2x2x1
jax: 0.10.0
libtpu: 0.0.40
codegen_flags: <defaults>
</compile_context>

<pallas_src>
import math
import functools

import jax
import jax.numpy as jnp
from jax import lax
from jax.experimental import pallas as pl
from jax.experimental.pallas import tpu as pltpu


@functools.lru_cache(maxsize=None)
def _vmem_limit_bytes():
    """3/4 of physical VMEM (96 MiB on v5e/v6e, 48 MiB on v7x), capped at 110 MiB."""
    cap = 64 * 1024 * 1024
    try:
        info = pltpu.get_tpu_info()
        cap = int(getattr(info, "vmem_capacity_bytes", cap))
    except Exception:
        pass
    return int(min(cap * 3 // 4, 110 * 1024 * 1024))


def _tile(dim, target, align=8):
    """Largest `align`-aligned divisor of `dim` that is <= target (full dim if none)."""
    if dim <= target:
        return dim
    for cand in range(min(target, dim), align - 1, -1):
        if dim % cand == 0 and cand % align == 0:
            return cand
    return dim


def _gelu_tanh(x):
    # TODO(synk): HF BERT default act is exact erf-GELU; tanh approximation used
    # here for guaranteed Mosaic lowering (numerics differ by <1e-3 per layer).
    c = 0.7978845608028654  # sqrt(2/pi)
    return 0.5 * x * (1.0 + jnp.tanh(c * (x + 0.044715 * x * x * x)))


# ----------------------------------------------------------------------------
# Linear:  y = act(x @ w + b).  Weight fully resident (constant index_map),
# tk == K (no k axis), grid only over M tiles.
# ----------------------------------------------------------------------------

def _linear_bias_kernel(x_ref, w_ref, b_ref, o_ref, *, activation):
    acc = jnp.dot(x_ref[...], w_ref[...], preferred_element_type=jnp.float32)
    acc = acc + b_ref[...]
    if activation == "gelu":
        acc = _gelu_tanh(acc)
    o_ref[...] = acc.astype(o_ref.dtype)


def _linear_nobias_kernel(x_ref, w_ref, o_ref, *, activation):
    acc = jnp.dot(x_ref[...], w_ref[...], preferred_element_type=jnp.float32)
    if activation == "gelu":
        acc = _gelu_tanh(acc)
    o_ref[...] = acc.astype(o_ref.dtype)


def linear(x, w, b=None, activation=None, out_dtype=jnp.bfloat16, tm=512):
    """y = x @ w (+ b) (+ gelu).  x: (M, K), w: (K, N), b: (N,) or None.

    The whole (K, N) weight (and bias) is held in VMEM for the duration of the
    call; only x / y stream in M tiles.  tm=512 keeps the footprint inside
    v7x's 64 MiB while the large M grid axis is 'parallel' for its 2 TCs.
    """
    M, K = x.shape
    N = w.shape[1]
    tm = _tile(M, tm, 8)
    grid = (M // tm,)

    in_specs = [
        pl.BlockSpec((tm, K), lambda i: (i, 0)),
        pl.BlockSpec((K, N), lambda i: (0, 0)),      # weight resident
    ]
    args = [x.astype(jnp.bfloat16), w.astype(jnp.bfloat16)]
    if b is not None:
        in_specs.append(pl.BlockSpec((1, N), lambda i: (0, 0)))
        args.append(b.reshape(1, N).astype(jnp.float32))
        kernel = functools.partial(_linear_bias_kernel, activation=activation)
    else:
        kernel = functools.partial(_linear_nobias_kernel, activation=activation)

    return pl.pallas_call(
        kernel,
        out_shape=jax.ShapeDtypeStruct((M, N), out_dtype),
        grid=grid,
        in_specs=in_specs,
        out_specs=pl.BlockSpec((tm, N), lambda i: (i, 0)),
        compiler_params=pltpu.CompilerParams(
            dimension_semantics=("parallel",),
            vmem_limit_bytes=_vmem_limit_bytes()),
    )(*args)


# ----------------------------------------------------------------------------
# Matmul with fused bias + residual-add + LayerNorm epilogue (weight resident,
# full contraction dim, grid over M only; output tile spans full hidden dim so
# LN stats are local).
# ----------------------------------------------------------------------------

def _matmul_res_ln_kernel(x_ref, w_ref, b_ref, r_ref, g_ref, beta_ref,
                          o_ref, *, eps):
    h = jnp.dot(x_ref[...], w_ref[...], preferred_element_type=jnp.float32)
    h = h + b_ref[...] + r_ref[...].astype(jnp.float32)
    mu = jnp.mean(h, axis=-1, keepdims=True)
    var = jnp.mean((h - mu) * (h - mu), axis=-1, keepdims=True)
    inv = lax.rsqrt(var + eps)
    o_ref[...] = ((h - mu) * inv * g_ref[...] + beta_ref[...]).astype(o_ref.dtype)


def matmul_residual_layernorm(x, w, b, residual, gamma, beta, eps=1e-12,
                              out_dtype=jnp.bfloat16, tm=512):
    """LayerNorm(x @ w + b + residual), LN over the last axis."""
    M, K = x.shape
    N = w.shape[1]
    tm = _tile(M, tm, 8)
    grid = (M // tm,)

    return pl.pallas_call(
        functools.partial(_matmul_res_ln_kernel, eps=eps),
        out_shape=jax.ShapeDtypeStruct((M, N), out_dtype),
        grid=grid,
        in_specs=[
            pl.BlockSpec((tm, K), lambda i: (i, 0)),
            pl.BlockSpec((K, N), lambda i: (0, 0)),   # weight resident
            pl.BlockSpec((1, N), lambda i: (0, 0)),
            pl.BlockSpec((tm, N), lambda i: (i, 0)),
            pl.BlockSpec((1, N), lambda i: (0, 0)),
            pl.BlockSpec((1, N), lambda i: (0, 0)),
        ],
        out_specs=pl.BlockSpec((tm, N), lambda i: (i, 0)),
        compiler_params=pltpu.CompilerParams(
            dimension_semantics=("parallel",),
            vmem_limit_bytes=_vmem_limit_bytes()),
    )(x.astype(jnp.bfloat16), w.astype(jnp.bfloat16),
      b.reshape(1, N).astype(jnp.float32),
      residual,
      gamma.reshape(1, N).astype(jnp.float32),
      beta.reshape(1, N).astype(jnp.float32))


# ----------------------------------------------------------------------------
# Fused embedding sum (word + pos + type) + LayerNorm.  Avoids writing an f32
# (B*S, H) intermediate to HBM; word embeddings arrive as bf16.
# ----------------------------------------------------------------------------

def _emb_ln_kernel(word_ref, pos_ref, tok_ref, g_ref, b_ref, o_ref, *, eps):
    h = (word_ref[...].astype(jnp.float32)
         + pos_ref[...].astype(jnp.float32)
         + tok_ref[...])
    mu = jnp.mean(h, axis=-1, keepdims=True)
    var = jnp.mean((h - mu) * (h - mu), axis=-1, keepdims=True)
    inv = lax.rsqrt(var + eps)
    o_ref[...] = ((h - mu) * inv * g_ref[...] + b_ref[...]).astype(o_ref.dtype)


def embed_layernorm(word_flat, pos, tok, gamma, beta, B, S, eps=1e-12,
                    out_dtype=jnp.bfloat16, ts=512):
    M, H = word_flat.shape
    ts = _tile(S, ts, 8)
    ns = S // ts
    return pl.pallas_call(
        functools.partial(_emb_ln_kernel, eps=eps),
        out_shape=jax.ShapeDtypeStruct((M, H), out_dtype),
        grid=(B, ns),
        in_specs=[
            pl.BlockSpec((ts, H), lambda b, si: (b * ns + si, 0)),
            pl.BlockSpec((ts, H), lambda b, si: (si, 0)),
            pl.BlockSpec((1, H), lambda b, si: (0, 0)),
            pl.BlockSpec((1, H), lambda b, si: (0, 0)),
            pl.BlockSpec((1, H), lambda b, si: (0, 0)),
        ],
        out_specs=pl.BlockSpec((ts, H), lambda b, si: (b * ns + si, 0)),
        compiler_params=pltpu.CompilerParams(
            dimension_semantics=("parallel", "parallel"),
            vmem_limit_bytes=_vmem_limit_bytes()),
    )(word_flat, pos.astype(jnp.float32), tok.astype(jnp.float32),
      gamma.reshape(1, H).astype(jnp.float32),
      beta.reshape(1, H).astype(jnp.float32))


# ----------------------------------------------------------------------------
# Flash-style attention over the fused (B*S, 3H) QKV buffer.
#   grid = (B, head_groups, q_tiles, kv_tiles)
# Heads are packed into 128-lane groups (2 heads for dH=64) so every BlockSpec
# last dim is 128-aligned.  Per-sequence lengths are scalar-prefetched: fully
# masked KV tiles are compute-skipped and their k/v DMA index is clamped so no
# new block is fetched.  The softmax 1/sqrt(dH) scale is pre-folded into Wq.
# ----------------------------------------------------------------------------

def _flash_attn_kernel(lens_ref, q_ref, k_ref, v_ref, m_ref, o_ref,
                       m_sc, l_sc, acc_sc, *, hg, dH, tkv):
    b = pl.program_id(0)
    ki = pl.program_id(3)

    @pl.when(ki == 0)
    def _():
        m_sc[...] = jnp.full_like(m_sc, -jnp.inf)
        l_sc[...] = jnp.zeros_like(l_sc)
        acc_sc[...] = jnp.zeros_like(acc_sc)

    # Skip KV tiles that are entirely padding for this sequence.
    @pl.when(ki * tkv < lens_ref[b])
    def _():
        for h in range(hg):                       # static per-head loop
            sl = slice(h * dH, (h + 1) * dH)
            qh = q_ref[:, sl]                     # (tq, dH) bf16
            kh = k_ref[:, sl]                     # (tkv, dH) bf16
            vh = v_ref[:, sl]                     # (tkv, dH) bf16
            s = lax.dot_general(qh, kh, (((1,), (1,)), ((), ())),
                                preferred_element_type=jnp.float32)
            s = s + m_ref[0]                      # (1, tkv) additive mask
            m_prev = m_sc[h]                      # (tq, 1)
            m_new = jnp.maximum(m_prev, jnp.max(s, axis=-1, keepdims=True))
            alpha = jnp.exp(m_prev - m_new)
            p = jnp.exp(s - m_new)
            l_sc[h] = alpha * l_sc[h] + jnp.sum(p, axis=-1, keepdims=True)
            acc_sc[h] = alpha * acc_sc[h] + jnp.dot(
                p.astype(vh.dtype), vh, preferred_element_type=jnp.float32)
            m_sc[h] = m_new

    @pl.when(ki == pl.num_programs(3) - 1)
    def _():
        for h in range(hg):
            inv_l = pl.reciprocal(l_sc[h], approx=True)
            o_ref[:, h * dH:(h + 1) * dH] = (acc_sc[h] * inv_l).astype(o_ref.dtype)


def flash_attention(qkv, add_mask, lens, B, S, nH, dH, out_dtype=jnp.bfloat16,
                    tq=512, tkv=512):
    """qkv: (B*S, 3*nH*dH) bf16, columns [q_heads | k_heads | v_heads].
       add_mask: (B, 1, S) f32 additive (0 / -1e9).  lens: (B,) int32 valid
       token counts.  Returns ctx (B*S, nH*dH)."""
    M = B * S
    H = nH * dH

    # Pack heads into 128-lane groups so BlockSpec last dims stay 128-aligned.
    hg = 1 if dH >= 128 else max(1, 128 // dH)
    if nH % hg != 0 or 128 % dH != 0:
        hg = 1  # TODO(synk): odd head counts / dH not dividing 128 need padding
    gw = hg * dH
    nG = nH // hg

    tq = _tile(S, tq, 8)
    tkv = _tile(S, tkv, 128)       # mask last dim must be 128-aligned or full S
    nq, nkv = S // tq, S // tkv

    def kv_row(b, ki, lens_ref):
        n_active = (lens_ref[b] + tkv - 1) // tkv
        return b * nkv + jnp.minimum(ki, jnp.maximum(n_active - 1, 0))

    q_spec = pl.BlockSpec((tq, gw), lambda b, g, qi, ki, lens: (b * nq + qi, g))
    k_spec = pl.BlockSpec((tkv, gw),
                          lambda b, g, qi, ki, lens: (kv_row(b, ki, lens), nG + g))
    v_spec = pl.BlockSpec((tkv, gw),
                          lambda b, g, qi, ki, lens: (kv_row(b, ki, lens), 2 * nG + g))
    m_spec = pl.BlockSpec((1, 1, tkv), lambda b, g, qi, ki, lens: (b, 0, ki))
    o_spec = pl.BlockSpec((tq, gw), lambda b, g, qi, ki, lens: (b * nq + qi, g))

    grid_spec = pltpu.PrefetchScalarGridSpec(
        num_scalar_prefetch=1,
        grid=(B, nG, nq, nkv),
        in_specs=[q_spec, k_spec, v_spec, m_spec],
        out_specs=o_spec,
        scratch_shapes=[pltpu.VMEM((hg, tq, 1), jnp.float32),
                        pltpu.VMEM((hg, tq, 1), jnp.float32),
                        pltpu.VMEM((hg, tq, dH), jnp.float32)])

    return pl.pallas_call(
        functools.partial(_flash_attn_kernel, hg=hg, dH=dH, tkv=tkv),
        out_shape=jax.ShapeDtypeStruct((M, H), out_dtype),
        grid_spec=grid_spec,
        compiler_params=pltpu.CompilerParams(
            dimension_semantics=("parallel", "parallel", "parallel", "arbitrary"),
            vmem_limit_bytes=_vmem_limit_bytes()),
    )(lens, qkv, qkv, qkv, add_mask)


# ----------------------------------------------------------------------------
# BERT forward (glue around the kernels)
# ----------------------------------------------------------------------------

def bert_layer(x, lens, add_mask, p, B, S, nH, dH):
    # Fused QKV projection (softmax scale pre-folded into the Q columns).
    qkv = linear(x, p["w_qkv"], p["b_qkv"])                        # (M, 3H)
    # Attention reads q/k/v head groups straight from the QKV buffer.
    ctx = flash_attention(qkv, add_mask, lens, B, S, nH, dH)       # (M, H)
    # Output projection with bias + residual + LayerNorm fused in the epilogue.
    x = matmul_residual_layernorm(ctx, p["wo"], p["bo"], x,
                                  p["ln1_g"], p["ln1_b"])
    # FFN: GELU fused into W1; W2 fused with bias + residual + LN.
    h = linear(x, p["w1"], p["b1"], activation="gelu")             # (M, inter)
    x = matmul_residual_layernorm(h, p["w2"], p["b2"], x,
                                  p["ln2_g"], p["ln2_b"])
    return x


def bert_wrapper_forward(params, input_ids, attention_mask):
    """Equivalent of BertWrapper.forward(input_ids, attention_mask):
       returns projector(CLS embedding), shape (B, feat_dim)."""
    B, S = input_ids.shape
    H = params["word_emb"].shape[1]
    nH = params["num_heads"]
    dH = H // nH

    # Embedding gathers stay in plain JAX; sum + LayerNorm fused in one kernel.
    word = jnp.take(params["word_emb"], input_ids.reshape(-1),
                    axis=0).astype(jnp.bfloat16)                    # (B*S, H)
    pos = params["pos_emb"][:S]                                     # (S, H)
    tok = params["type_emb"][0].reshape(1, H)                       # (1, H)
    x = embed_layernorm(word, pos, tok,
                        params["emb_ln_g"], params["emb_ln_b"], B, S)

    # Extended additive attention mask (f32) + per-sequence valid lengths.
    add_mask = (1.0 - attention_mask.astype(jnp.float32))[:, None, :] * -1e9
    lens = jnp.sum(attention_mask.astype(jnp.int32), axis=-1)       # (B,)

    for lp in params["layers"]:
        x = bert_layer(x, lens, add_mask, lp, B, S, nH, dH)

    # use_cls_token=True path of BertWrapper.
    cls = x.reshape(B, S, H)[:, 0, :]                               # (B, H)
    # projector == 'linear': Linear(H, feat_dim, bias=False).  Pad rows to a
    # multiple of 8 sublanes so the tiny matmul stores are not masked.
    Bp = ((B + 7) // 8) * 8
    cls_p = jnp.pad(cls, ((0, Bp - B), (0, 0))) if Bp != B else cls
    proj = linear(cls_p, params["proj_w"], None, out_dtype=jnp.float32, tm=Bp)
    return proj[:B]


# ----------------------------------------------------------------------------
# Deterministic parameter init (scaled-down BERT)
# ----------------------------------------------------------------------------

def init_params(key, vocab, max_pos, type_vocab, H, inter, num_layers, num_heads,
                feat_dim):
    ks = jax.random.split(key, 4 + num_layers)
    std = 0.02
    dH = H // num_heads
    attn_scale = 1.0 / math.sqrt(dH)

    def nrm(k, shape):
        return (std * jax.random.normal(k, shape)).astype(jnp.float32)

    params = {
        "num_heads": num_heads,
        "word_emb": nrm(ks[0], (vocab, H)),
        "pos_emb": nrm(ks[1], (max_pos, H)),
        "type_emb": nrm(ks[2], (type_vocab, H)),
        "emb_ln_g": jnp.ones((H,), jnp.float32),
        "emb_ln_b": jnp.zeros((H,), jnp.float32),
        "proj_w": nrm(ks[3], (H, feat_dim)),
        "layers": [],
    }
    for li in range(num_layers):
        lk = jax.random.split(ks[4 + li], 6)
        wq, wk, wv = nrm(lk[0], (H, H)), nrm(lk[1], (H, H)), nrm(lk[2], (H, H))
        bq = jnp.zeros((H,), jnp.float32)
        bk = jnp.zeros((H,), jnp.float32)
        bv = jnp.zeros((H,), jnp.float32)
        params["layers"].append({
            # fused QKV weight/bias, column layout [q | k | v]; 1/sqrt(dH)
            # softmax scale folded into the Q columns (parameter rewrite).
            "w_qkv": jnp.concatenate([wq * attn_scale, wk, wv], axis=1),
            "b_qkv": jnp.concatenate([bq * attn_scale, bk, bv]),
            "wo": nrm(lk[3], (H, H)), "bo": jnp.zeros((H,), jnp.float32),
            "ln1_g": jnp.ones((H,), jnp.float32),
            "ln1_b": jnp.zeros((H,), jnp.float32),
            "w1": nrm(lk[4], (H, inter)), "b1": jnp.zeros((inter,), jnp.float32),
            "w2": nrm(lk[5], (inter, H)), "b2": jnp.zeros((H,), jnp.float32),
            "ln2_g": jnp.ones((H,), jnp.float32),
            "ln2_b": jnp.zeros((H,), jnp.float32),
        })
    return params


# ----------------------------------------------------------------------------
# Main
# ----------------------------------------------------------------------------

if __name__ == "__main__":
    # Scaled-down BERT with production-like head_dim=64 (exercises head packing).
    B, S = 2, 16
    nH, dH = 4, 64
    H = nH * dH                 # 256
    num_layers = 2
    inter = 4 * H               # 1024
    vocab, max_pos, type_vocab = 100, 32, 2
    feat_dim = 128              # lane-dense toy projector width (real model: 512)

    key = jax.random.PRNGKey(0)
    k_params, k_ids = jax.random.split(key)

    params = init_params(k_params, vocab, max_pos, type_vocab, H, inter,
                         num_layers, nH, feat_dim)

    input_ids = jax.random.randint(k_ids, (B, S), 0, vocab, dtype=jnp.int32)
    attention_mask = jnp.ones((B, S), jnp.int32).at[1, 12:].set(0)  # pad batch 1

    out = bert_wrapper_forward(params, input_ids, attention_mask)
    jax.block_until_ready(out)
    assert out.shape == (B, feat_dim) and out.dtype == jnp.float32
    assert bool(jnp.all(jnp.isfinite(out)))
    print("KERNEL_OK")
</pallas_src>

<mosaic_0001>
module attributes {stable_mosaic.version = 11 : i64} {
  func.func @_emb_ln_kernel(%arg0: i32, %arg1: i32, %arg2: memref<16x256xbf16, #tpu.memory_space<vmem>>, %arg3: memref<16x256xf32, #tpu.memory_space<vmem>>, %arg4: memref<1x256xf32, #tpu.memory_space<vmem>>, %arg5: memref<1x256xf32, #tpu.memory_space<vmem>>, %arg6: memref<1x256xf32, #tpu.memory_space<vmem>>, %arg7: memref<16x256xbf16, #tpu.memory_space<vmem>>) attributes {dimension_semantics = [#tpu.dimension_semantics<parallel>, #tpu.dimension_semantics<parallel>], iteration_bounds = array<i64: 2, 1>, scalar_prefetch = 0 : i64, scratch_operands = 0 : i64, tpu.core_type = #tpu.core_type<tc>, window_params = [{transform_indices = @transform_0, window_bounds = array<i64: 16, 256>}, {transform_indices = @transform_1, window_bounds = array<i64: 16, 256>}, {pipeline_mode = #tpu.pipeline_mode<synchronous>, transform_indices = @transform_2, window_bounds = array<i64: 1, 256>}, {pipeline_mode = #tpu.pipeline_mode<synchronous>, transform_indices = @transform_3, window_bounds = array<i64: 1, 256>}, {pipeline_mode = #tpu.pipeline_mode<synchronous>, transform_indices = @transform_4, window_bounds = array<i64: 1, 256>}, {transform_indices = @transform_5, window_bounds = array<i64: 16, 256>}]} {
    %c0 = arith.constant 0 : index
    %c0_0 = arith.constant 0 : index
    %0 = vector.load %arg2[%c0, %c0_0] : memref<16x256xbf16, #tpu.memory_space<vmem>>, vector<16x256xbf16>
    %1 = arith.extf %0 : vector<16x256xbf16> to vector<16x256xf32>
    %c0_1 = arith.constant 0 : index
    %c0_2 = arith.constant 0 : index
    %2 = vector.load %arg3[%c0_1, %c0_2] : memref<16x256xf32, #tpu.memory_space<vmem>>, vector<16x256xf32>
    %3 = arith.addf %1, %2 : vector<16x256xf32>
    %c0_3 = arith.constant 0 : index
    %c0_4 = arith.constant 0 : index
    %4 = vector.load %arg4[%c0_3, %c0_4] : memref<1x256xf32, #tpu.memory_space<vmem>>, vector<1x256xf32>
    %5 = vector.broadcast %4 : vector<1x256xf32> to vector<16x256xf32>
    %6 = arith.addf %3, %5 : vector<16x256xf32>
    %cst = arith.constant dense<0.000000e+00> : vector<16xf32>
    %7 = vector.multi_reduction <add>, %6, %cst [1] : vector<16x256xf32> to vector<16xf32>
    %8 = vector.shape_cast %7 : vector<16xf32> to vector<16x1xf32>
    %cst_5 = arith.constant 2.560000e+02 : f32
    %9 = vector.broadcast %cst_5 : f32 to vector<16x1xf32>
    %10 = arith.divf %8, %9 : vector<16x1xf32>
    %11 = vector.broadcast %10 : vector<16x1xf32> to vector<16x256xf32>
    %12 = arith.subf %6, %11 : vector<16x256xf32>
    %13 = vector.broadcast %10 : vector<16x1xf32> to vector<16x256xf32>
    %14 = arith.subf %6, %13 : vector<16x256xf32>
    %15 = arith.mulf %12, %14 : vector<16x256xf32>
    %cst_6 = arith.constant dense<0.000000e+00> : vector<16xf32>
    %16 = vector.multi_reduction <add>, %15, %cst_6 [1] : vector<16x256xf32> to vector<16xf32>
    %17 = vector.shape_cast %16 : vector<16xf32> to vector<16x1xf32>
    %cst_7 = arith.constant 2.560000e+02 : f32
    %18 = vector.broadcast %cst_7 : f32 to vector<16x1xf32>
    %19 = arith.divf %17, %18 : vector<16x1xf32>
    %cst_8 = arith.constant 9.99999996E-13 : f32
    %20 = vector.broadcast %cst_8 : f32 to vector<16x1xf32>
    %21 = arith.addf %19, %20 : vector<16x1xf32>
    %22 = math.rsqrt %21 : vector<16x1xf32>
    %23 = vector.broadcast %10 : vector<16x1xf32> to vector<16x256xf32>
    %24 = arith.subf %6, %23 : vector<16x256xf32>
    %25 = vector.broadcast %22 : vector<16x1xf32> to vector<16x256xf32>
    %26 = arith.mulf %24, %25 : vector<16x256xf32>
    %c0_9 = arith.constant 0 : index
    %c0_10 = arith.constant 0 : index
    %27 = vector.load %arg5[%c0_9, %c0_10] : memref<1x256xf32, #tpu.memory_space<vmem>>, vector<1x256xf32>
    %28 = vector.broadcast %27 : vector<1x256xf32> to vector<16x256xf32>
    %29 = arith.mulf %26, %28 : vector<16x256xf32>
    %c0_11 = arith.constant 0 : index
    %c0_12 = arith.constant 0 : index
    %30 = vector.load %arg6[%c0_11, %c0_12] : memref<1x256xf32, #tpu.memory_space<vmem>>, vector<1x256xf32>
    %31 = vector.broadcast %30 : vector<1x256xf32> to vector<16x256xf32>
    %32 = arith.addf %29, %31 : vector<16x256xf32>
    %33 = arith.truncf %32 : vector<16x256xf32> to vector<16x256xbf16>
    %c0_13 = arith.constant 0 : index
    %c0_14 = arith.constant 0 : index
    %34 = vector.load %arg7[%c0_13, %c0_14] : memref<16x256xbf16, #tpu.memory_space<vmem>>, vector<16x256xbf16>
    tpu.vector_store %arg7[%c0_13, %c0_14], %33 {strides = array<i32>} : memref<16x256xbf16, #tpu.memory_space<vmem>>, vector<16x256xbf16>,
    return
  }
  func.func @transform_0(%arg0: i32, %arg1: i32) -> (i32, i32) {
    %c1_i32 = arith.constant 1 : i32
    %0 = arith.muli %arg0, %c1_i32 : i32
    %1 = arith.addi %0, %arg1 : i32
    %c0_i32 = arith.constant 0 : i32
    %c0_i32_0 = arith.constant 0 : i32
    return %1, %c0_i32 : i32, i32
  }
  func.func @transform_1(%arg0: i32, %arg1: i32) -> (i32, i32) {
    %c0_i32 = arith.constant 0 : i32
    %c0_i32_0 = arith.constant 0 : i32
    return %arg1, %c0_i32 : i32, i32
  }
  func.func @transform_2(%arg0: i32, %arg1: i32) -> (i32, i32) {
    %c0_i32 = arith.constant 0 : i32
    %c0_i32_0 = arith.constant 0 : i32
    %c0_i32_1 = arith.constant 0 : i32
    return %c0_i32, %c0_i32_0 : i32, i32
  }
  func.func @transform_3(%arg0: i32, %arg1: i32) -> (i32, i32) {
    %c0_i32 = arith.constant 0 : i32
    %c0_i32_0 = arith.constant 0 : i32
    %c0_i32_1 = arith.constant 0 : i32
    return %c0_i32, %c0_i32_0 : i32, i32
  }
  func.func @transform_4(%arg0: i32, %arg1: i32) -> (i32, i32) {
    %c0_i32 = arith.constant 0 : i32
    %c0_i32_0 = arith.constant 0 : i32
    %c0_i32_1 = arith.constant 0 : i32
    return %c0_i32, %c0_i32_0 : i32, i32
  }
  func.func @transform_5(%arg0: i32, %arg1: i32) -> (i32, i32) {
    %c1_i32 = arith.constant 1 : i32
    %0 = arith.muli %arg0, %c1_i32 : i32
    %1 = arith.addi %0, %arg1 : i32
    %c0_i32 = arith.constant 0 : i32
    %c0_i32_0 = arith.constant 0 : i32
    return %1, %c0_i32 : i32, i32
  }
}

</mosaic_0001>

<bundles_post_ra>
// kernel: tpu_custom_call.1
= control target key start
LH: loop header
LB: loop body
LE: loop exit
PB: predicated region body
PF: predicated region fallthrough
CT: control target
= control target key end

     0   :  { %10 = vsyncpa [#allocation3], 0  ;;  %s1037_s0 = inlined_call_operand.hbm [shape: bf16[32,256], index: 0, kind: input, shape index: {}]   ;;  %s1038_s1 = inlined_call_operand.hbm [shape: f32[16,256], index: 1, kind: input, shape index: {}]   ;;  %s1039_s2 = inlined_call_operand.vmem [shape: f32[1,256], index: 2, kind: input, shape index: {}]   ;;  %s1040_s3 = inlined_call_operand.vmem [shape: f32[1,256], index: 3, kind: input, shape index: {}]   ;;  %s1041_s4 = inlined_call_operand.vmem [shape: f32[1,256], index: 4, kind: input, shape index: {}]   ;;  %s1042_s5 = inlined_call_operand.hbm [shape: bf16[32,256], index: 5, kind: output, shape index: {}]  }
   0x1   :  { %12 = vsyncpa [#allocation3 + $0x1], 0 }
   0x2   :  { %13 = vsyncpa [#allocation6], 0 }
   0x3   :  { %14 = vsyncpa [#allocation4], 0 }
   0x4   :  { %16 = vsyncpa [#allocation4 + $0x1], 0  ;;  %s805_s18 = smov 0   ;;  %s807_s19 = smov 0  }
   0x5   :  { %s809_s20 = smov 0   ;;  %s811_s21 = smov 0  }
   0x6   :  { %s813_s22 = smov 0   ;;  %s815_s23 = smov 0  }
   0x7 LB: > { %s510_s24 = sadd.s32 4294967295, %s764_s23   ;;  %s511_s25 = sadd.s32 4294967294, %s764_s23   ;;  %s764_s23 = sphi %s815_s23, %s22_s23   ;;  %s760_s22 = sphi %s813_s22, %s1066_s22   ;;  %s756_s21 = sphi %s811_s21, %s1065_s21   ;;  %s752_s20 = sphi %s809_s20, %s1064_s20   ;;  %s748_s19 = sphi %s807_s19, %s1063_s19   ;;  %s744_s18 = sphi %s805_s18, %s1062_s18  }
   0x8   : > { %p56_p0 = scmp.ne.s32.totalorder %s748_s19, %s744_s18  ;;  %p839_p1 = scmp.eq.s32.totalorder %s510_s24, 0 }
   0x9   : > { %p843_p2 = scmp.eq.s32.totalorder %s510_s24, 1  ;;  %p177_p3 = scmp.eq.s32.totalorder %s511_s25, 1 }
   0xa   : > { %s1047_s26 = scalar_select %p839_p1, 1, 0 }
   0xb   : > { %s1048_s27 = scalar_select %p843_p2, 1, 0 }
   0xc   : > { %p849_p4 = por %p839_p1, %p56_p0  ;;  %p512_p5 = scmp.ge.s32.totalorder %s764_s23, 1 }
   0xd   : > { %p854_p6 = por %p177_p3, %p56_p0  ;;  %p184_p7 = scmp.lt.s32.totalorder %s764_s23, 3 }
   0xe   : > { %s1049_s28 = scalar_select %p849_p4, 1, 0 }
   0xf   : > { %s1050_s29 = scalar_select %p854_p6, 1, 0 }
  0x10   : > { %p859_p8 = pnand %p512_p5, %p184_p7  ;;  %s766_s6 = smov [#allocation5]  }
  0x11   : > { %s200_s7 = sshll.u32 %s766_s6, 4  ;;  %s34_s9 = sadd.s32 1, %s760_s22  ;;  %s201_s7 = int_to_ptr.vmem [resolvable:$true] %s200_s7 }
  0x12   : > { %s1051_s30 = scalar_select %p859_p8, 1, 0 }
  0x13   : > { %p545_p9 = pneg %p859_p8  ;;  %s620_s12 = scalar_lea.hbm %s1038_s1, 512 }
  0x14   : > { %p621_p12 = scmp.ne.s32.totalorder %s1038_s1, %s620_s12  ;;  %p627_p5 = scmp.lt.u32.totalorder %s620_s12, %s1038_s1 }
  0x15   : > { %p868_p11 = pnand %p545_p9, %p839_p1 }
  0x17   : > { %p622_p13 = pneg %p868_p11 }
  0x19   : > { %p623_p0 = pnand %p622_p13, %p621_p12 }
  0x1b   : > { %p624_p3 = pneg %p623_p0 }
  0x1d   : > { %p629_p7 = pnand %p627_p5, %p624_p3 }
  0x1f   : > { %632 = shalt.err (!%p629_p7)
}
  0x20   : > { %s633_s17 = scalar_lea.vmem %s201_s7, 512  ;;  %p641_p1 = scmp.lt.s32.totalorder %s201_s7, %s201_s7 }
  0x21   : > { %p634_p9 = scmp.ne.s32.totalorder %s201_s7, %s633_s17  ;;  %p642_p4 = scmp.lt.s32.totalorder %s633_s17, %s633_s17 }
  0x23   : > { %p636_p10 = pnand %p634_p9, %p622_p13  ;;  %p643_p8 = por %p642_p4, %p641_p1 }
  0x25   : > { %p637_p6 = pneg %p636_p10 }
  0x27   : > { %p644_p2 = pnand %p643_p8, %p637_p6 }
  0x29   : > { %647 = shalt.err (!%p644_p2)
}
  0x2a   : > { %s767_s24 = smov 256   ;;  %s768_s25 = smov 16  }
  0x2b   : > { %548 = dma.hbm_to_vmem [thread:$0]  (!%p868_p11), %s1038_s1, 512, %s201_s7, [#allocation6], %s767_s24, %s767_s24, %s768_s25  }
  0x2c   : > { %p36_p1 = scmp.ge.s32.totalorder %s34_s9, 2  ;;  %s43_s11 = sadd.s32 1, %s752_s20 }
  0x2d   : > { %p50_p2 = scmp.ne.s32.totalorder %s752_s20, %s748_s19  ;;  %p51_p4 = scmp.eq.s32.totalorder %s764_s23, 0 }
  0x2e   : > { %s1068_s9 = smov (%p36_p1, %s34_s9), 0  ;;  %p1054_p8 = scmp.ne.s32.totalorder %s1048_s27, 0 }
  0x2f   : > { %p895_p6 = por %p51_p4, %p50_p2  ;;  %s40_s8 = ssub.s32 %s760_s22, %s1068_s9 }
  0x30   : > { %p901_p10 = por %p1054_p8, %p50_p2  ;;  %p558_p12 = scmp.lt.s32.totalorder %s764_s23, 2 }
  0x31   : > { %p41_p11 = scmp.eq.s32.totalorder %s40_s8, 0  ;;  %s223_s7 = sand.u32 1, %s752_s20  }
  0x32   : > { %s515_s14 = sshll.u32 %s223_s7, 4  ;;  %s532_s16 = sshll.u32 %s760_s22, 8 }
  0x33   : > { %s910_s15 = scalar_select %p41_p11, %s752_s20, %s43_s11  }
  0x34   : > { %s916_s25 = scalar_lea.hbm %s1037_s0, %s532_s16  ;;  %s227_s27 = scalar_lea.vmem [#allocation2], %s515_s14 }
  0x35   : > { %s236_s6 = sshll.u32 %s227_s27, 4  ;;  %p922_p13 = pnand %p558_p12, %p895_p6  ;;  %s918_s6 = int_to_ptr.vmem [resolvable:$true] %s236_s6 }
  0x36   : > { %s926_s11 = scalar_lea.sflag [#allocation3], %s223_s7  ;;  %s648_s8 = scalar_lea.hbm %s916_s25, 256 }
  0x37   : > { %p649_p0 = scmp.ne.s32.totalorder %s916_s25, %s648_s8  ;;  %p650_p3 = pneg %p922_p13 }
  0x38   : > { %s653_s12 = scalar_lea.hbm %s1037_s0, 512  ;;  %p654_p9 = scmp.lt.u32.totalorder %s916_s25, %s1037_s0 }
  0x39   : > { %p651_p5 = pnand %p650_p3, %p649_p0  ;;  %p655_p1 = scmp.lt.u32.totalorder %s653_s12, %s648_s8 }
  0x3a   : > { %p657_p4 = scmp.lt.u32.totalorder %s648_s8, %s916_s25 }
  0x3b   : > { %p652_p7 = pneg %p651_p5  ;;  %p656_p2 = por %p655_p1, %p654_p9 }
  0x3d   : > { %p658_p6 = por %p657_p4, %p656_p2 }
  0x3f   : > { %p659_p8 = pnand %p658_p6, %p652_p7 }
  0x41   : > { %662 = shalt.err (!%p659_p8)
}
  0x42   : > { %s663_s7 = scalar_lea.vmem %s918_s6, 256  ;;  %s769_s27 = smov [#allocation2]  }
  0x43   : > { %p664_p12 = scmp.ne.s32.totalorder %s918_s6, %s663_s7  ;;  %s668_s14 = sshll.u32 %s769_s27, 4  ;;  %s669_s14 = int_to_ptr.vmem [resolvable:$false] %s668_s14 }
  0x44   : > { %s670_s16 = scalar_lea.vmem %s669_s14, 512  ;;  %p671_p5 = scmp.lt.s32.totalorder %s918_s6, %s669_s14 }
  0x45   : > { %p666_p11 = pnand %p664_p12, %p650_p3  ;;  %p672_p9 = scmp.lt.s32.totalorder %s670_s16, %s663_s7 }
  0x47   : > { %p667_p0 = pneg %p666_p11  ;;  %p673_p1 = por %p672_p9, %p671_p5 }
  0x49   : > { %p674_p2 = pnand %p673_p1, %p667_p0 }
  0x4b   : > { %677 = shalt.err (!%p674_p2)
}
  0x4c   : > { %s770_s8 = smov 128   ;;  %s771_s12 = smov 8  }
  0x4d   : > { %552 = dma.hbm_to_vmem [thread:$0]  (!%p922_p13), %s916_s25, 256, %s918_s6, %s926_s11, %s770_s8, %s770_s8, %s771_s12  }
  0x4e   : > { %p1057_p3 = scmp.ne.s32.totalorder %s1051_s30, 0 }
  0x4f   : > { %s957_s17 = sand.u32 (!%p1057_p3), 1, %s748_s19   ;;  %p1058_p7 = scmp.ne.s32.totalorder (!%p1057_p3), %s1049_s28, 0 }
  0x50   : > { %248 = sbr.rel (%p1057_p3) target bundleno = 437 (0x1b5), region = 40  ;;  %s520_s24 = sshll.u32 (!%p1057_p3), %s957_s17, 4 }
  0x51   : > { %s251_s7 = scalar_lea.sflag (!%p1057_p3), [#allocation3], %s957_s17  ;;  %s254_s27 = scalar_lea.vmem (!%p1057_p3), [#allocation2], %s520_s24 }
  0x57   : > { %731 = dma.done.wait (%p1058_p7), %s251_s7, 256  }
  0x58   : > { %733 = vsyncadd (%p1058_p7), %s251_s7, 4294967040  ;;  %p1059_p13 = scmp.ne.s32.totalorder %s1047_s26, 0 }
  0x5a   : > { %735 = dma.done.wait (%p1059_p13), [#allocation6], 512  }
  0x5b   : > { %737 = vsyncadd (%p1059_p13), [#allocation6], 4294966784  ;;  %v306_v0 = vlaneseq  ;;  %v290_v4 = vld [vmem:[%s254_s27] sm:$0xff]  ;;  %v297_v6 = vld [vmem:[#allocation5 + $0x8] sm:$0xff]  ;;  %s536_s11 = sshll.u32 %s756_s21, 8  ;;  %s284_s14 = scalar_lea.vmem [#allocation7], %s520_s24 }
  0x5c   : > { %v296_v5 = vld [vmem:[#allocation5] sm:$0xff]  ;;  %v292_v7 = vunpack.c.l.bf16 %v290_v4  ;;  %v293_v8 = vunpack.c.h.bf16 %v290_v4  ;;  %v291_v12 = vld [vmem:[%s254_s27 + $0x8] sm:$0xff]  ;;  %v298_v15 = vld [vmem:[#allocation5 + $0x10] sm:$0xff]  ;;  %s415_s16 = sshll.u32 %s284_s14, 4  ;;  %s986_s7 = scalar_lea.hbm %s1042_s5, %s536_s11  ;;  %s988_s16 = int_to_ptr.vmem [resolvable:$true] %s415_s16 }
  0x5d   : > { %v307_v1 = vshrl.u32 %v306_v0, 7  ;;  %v304_v9 = vld [vmem:[%s1039_s2] sm:$0x3]  ;;  %v299_v16 = vld [vmem:[#allocation5 + $0x18] sm:$0xff]  ;;  %v294_v17 = vunpack.c.l.bf16 %v291_v12  ;;  %v295_v18 = vunpack.c.h.bf16 %v291_v12  ;;  %s400_s27 = scalar_lea.sflag [#allocation4], %s957_s17  ;;  %s678_s21 = scalar_lea.vmem %s988_s16, 256 }
  0x5e   : > { %v300_v13 = vadd.f32 %v296_v5, %v292_v7  ;;  %v301_v14 = vadd.f32 %v297_v6, %v293_v8  ;;  %v353_v47 = vld [vmem:[%s1040_s3] sm:$0x3]  ;;  %p679_p4 = scmp.ne.s32.totalorder %s988_s16, %s678_s21  ;;  %s772_s24 = smov [#allocation7]  }
  0x5f   : > { %v308_v2 = vsub.s32 0, %v307_v1  ;;  %v312_v3 = vsub.s32 1, %v307_v1  ;;  %v302_v21 = vadd.f32 %v298_v15, %v294_v17  ;;  %v303_v22 = vadd.f32 %v299_v16, %v295_v18  ;;  %v369_v48 = vld [vmem:[%s1041_s4] sm:$0x3]  ;;  %s682_s30 = sshll.u32 %s772_s24, 4  ;;  %s683_s30 = int_to_ptr.vmem [resolvable:$false] %s682_s30 }
  0x60   : > { %p680_p6 = pnand %p679_p4, %p901_p10  ;;  %s684_s25 = scalar_lea.vmem %s683_s30, 512 }
  0x61   : > { %v309_v10 = vrot.slane %v304_v9, %v308_v2  ;;  %v313_v11 = vrot.slane %v304_v9, %v312_v3  ;;  %v358_v49 = vrot.slane %v353_v47, %v308_v2  ;;  %v362_v50 = vrot.slane %v353_v47, %v312_v3  ;;  %p685_p12 = scmp.lt.s32.totalorder %s988_s16, %s683_s30  ;;  %p686_p11 = scmp.lt.s32.totalorder %s684_s25, %s678_s21 }
  0x62   : > { %v374_v52 = vrot.slane %v369_v48, %v308_v2  ;;  %v378_v53 = vrot.slane %v369_v48, %v312_v3  ;;  %p681_p8 = pneg %p680_p6 }
  0x63   : > { %v316_v19 = vadd.f32 %v309_v10, %v300_v13  ;;  %v317_v20 = vadd.f32 %v313_v11, %v301_v14  ;;  %v318_v24 = vadd.f32 %v309_v10, %v302_v21  ;;  %v319_v25 = vadd.f32 %v313_v11, %v303_v22  ;;  %p687_p0 = por %p686_p11, %p685_p12 }
  0x65   : > { %v320_v23 = vadd.f32 %v317_v20, %v316_v19  ;;  %v323_v26 = vadd.f32 %v319_v25, %v318_v24  ;;  %p688_p5 = pnand %p687_p0, %p681_p8 }
  0x67   : > { %321 = vadd.xlane.f32.xlu0 %v320_v23 }
  0x6b   : > { %324 = vadd.xlane.f32.xlu0 %v323_v26 }
  0xf4   : > { %v322_v27 = vpop.xlane.xlu0 %321 }
  0xf5   : > { %v327_v28 = vmul.f32 0.00390625, %v322_v27 }
  0xf7   : > { %v329_v29 = vsub.f32 %v316_v19, %v327_v28  ;;  %v330_v30 = vsub.f32 %v317_v20, %v327_v28 }
  0xf8   : > { %v325_v31 = vpop.xlane.xlu0 %324 }
  0xf9   : > { %v328_v32 = vmul.f32 0.00390625, %v325_v31  ;;  %v333_v33 = vmul.f32 %v329_v29, %v329_v29  ;;  %v334_v34 = vmul.f32 %v330_v30, %v330_v30 }
  0xfb   : > { %v331_v35 = vsub.f32 %v318_v24, %v328_v32  ;;  %v332_v36 = vsub.f32 %v319_v25, %v328_v32  ;;  %v337_v37 = vadd.f32 %v334_v34, %v333_v33 }
  0xfd   : > { %338 = vadd.xlane.f32.xlu1 %v337_v37  ;;  %v335_v38 = vmul.f32 %v331_v35, %v331_v35  ;;  %v336_v39 = vmul.f32 %v332_v36, %v332_v36 }
  0xff   : > { %v340_v40 = vadd.f32 %v336_v39, %v335_v38 }
 0x101   : > { %341 = vadd.xlane.f32.xlu1 %v340_v40 }
 0x18a   : > { %v339_v41 = vpop.xlane.xlu1 %338 }
 0x18b   : > { %v343_v42 = vmul.f32 0.00390625, %v339_v41 }
 0x18d   : > { %v345_v43 = vadd.f32 1e-12, %v343_v42 }
 0x18e   : > { %v342_v44 = vpop.xlane.xlu1 %341 }
 0x18f   : > { %616 = vrsqrt.f32 %v345_v43  ;;  %v344_v45 = vmul.f32 0.00390625, %v342_v44 }
 0x191   : > { %v346_v46 = vadd.f32 1e-12, %v344_v45 }
 0x193   : > { %618 = vrsqrt.f32 %v346_v46 }
 0x199   : > { %v617_v51 = vpop.eup %616 }
 0x19a   : > { %v349_v54 = vmul.f32 %v617_v51, %v329_v29  ;;  %v350_v55 = vmul.f32 %v617_v51, %v330_v30 }
 0x19c   : > { %v365_v56 = vmul.f32 %v358_v49, %v349_v54  ;;  %v366_v57 = vmul.f32 %v362_v50, %v350_v55 }
 0x19d   : > { %v619_v58 = vpop.eup %618 }
 0x19e   : > { %v381_v59 = vadd.f32 %v374_v52, %v365_v56  ;;  %v382_v60 = vadd.f32 %v378_v53, %v366_v57  ;;  %v351_v61 = vmul.f32 %v619_v58, %v331_v35  ;;  %v352_v62 = vmul.f32 %v619_v58, %v332_v36 }
 0x1a0   : > { %v533_v63 = vpack.c.bf16 %v382_v60, %v381_v59  ;;  %v367_v0 = vmul.f32 %v358_v49, %v351_v61  ;;  %v368_v1 = vmul.f32 %v362_v50, %v352_v62 }
 0x1a2   : > { %v383_v2 = vadd.f32 %v374_v52, %v367_v0  ;;  %v384_v3 = vadd.f32 %v378_v53, %v368_v1  ;;  %397 = vst [vmem:[%s284_s14] sm:$0xff] %v533_v63 }
 0x1a4   : > { %v534_v4 = vpack.c.bf16 %v384_v3, %v383_v2 }
 0x1a6   : > { %398 = vst [vmem:[%s284_s14 + $0x8] sm:$0xff] %v534_v4 }
 0x1a7   : > { %691 = shalt.err (!%p688_p5)
}
 0x1a8   : > { %s692_s26 = scalar_lea.hbm %s986_s7, 256  ;;  %s696_s10 = scalar_lea.hbm %s1042_s5, 512 }
 0x1a9   : > { %p693_p9 = scmp.ne.s32.totalorder %s986_s7, %s692_s26  ;;  %p697_p3 = scmp.lt.u32.totalorder %s986_s7, %s1042_s5 }
 0x1aa   : > { %p698_p7 = scmp.lt.u32.totalorder %s696_s10, %s692_s26  ;;  %p700_p4 = scmp.lt.u32.totalorder %s692_s26, %s986_s7 }
 0x1ab   : > { %p694_p1 = pnand %p693_p9, %p901_p10 }
 0x1ac   : > { %p699_p13 = por %p698_p7, %p697_p3 }
 0x1ad   : > { %p695_p2 = pneg %p694_p1 }
 0x1ae   : > { %p701_p6 = por %p700_p4, %p699_p13 }
 0x1b0   : > { %p702_p8 = pnand %p701_p6, %p695_p2 }
 0x1b2   : > { %705 = shalt.err (!%p702_p8)
}
 0x1b3   : > { %s773_s8 = smov 128   ;;  %s774_s12 = smov 8  }
 0x1b4   : > { %543 = dma.vmem_to_hbm [thread:$0]  (%p901_p10), %s988_s16, 256, %s986_s7, %s400_s27, %s773_s8, %s773_s8, %s774_s12  }
 0x1b5 PF: > { %s430_s21 = sand.u32 1, %s744_s18   ;;  %p1060_p12 = scmp.ne.s32.totalorder %s1050_s29, 0 }
 0x1b6   : > { %p1061_p11 = scmp.ge.s32.totalorder %s764_s23, 2  ;;  %s431_s24 = scalar_lea.sflag [#allocation4], %s430_s21 }
 0x1b8   : > { %p554_p0 = pnand %p1061_p11, %p1060_p12 }
 0x1ba   : > { %739 = dma.done.wait (!%p554_p0), %s431_s24, 256  }
 0x1bb   : > { %741 = vsyncadd (!%p554_p0), %s431_s24, 4294967040  ;;  %s22_s23 = sadd.s32 1, %s764_s23   ;;  %s1062_s18 = smov %s748_s19 }
 0x1bc   : > { %p19_p5 = scmp.ge.s32.totalorder %s22_s23, 4   ;;  %s1063_s19 = smov %s752_s20 }
 0x1bd   : > { %s1064_s20 = smov %s910_s15  ;;  %s1065_s21 = smov %s760_s22 }
 0x1be   : > { %s1066_s22 = smov %s1068_s9  ;;  %21 = sbr.rel (!%p19_p5) target bundleno = 7 (0x7), region = 90 }
 0x1c5   :  { %436 = vsyncpa [#allocation3], 1 }
 0x1c6   :  { %438 = vsyncpa [#allocation3 + $0x1], 1 }
 0x1c7   :  { %439 = vsyncpa [#allocation6], 1 }
 0x1c8   :  { %440 = vsyncpa [#allocation4], 1 }
 0x1c9   :  { %442 = vsyncpa [#allocation4 + $0x1], 1 }

</bundles_post_ra>
